<compile_context>
chip_gen: v5e
topology: v5e:2x2
jax: 0.10.0
libtpu: 0.0.40
codegen_flags: <defaults>
</compile_context>

<pallas_src>
import functools

import jax
import jax.numpy as jnp
from jax.experimental import pallas as pl
from jax.experimental.pallas import tpu as pltpu

# Layer dims of HandLandmark: 21*3 -> 60 -> 40 -> 30 -> 30
LAYER_DIMS = ((63, 60), (60, 40), (40, 30), (30, 30))
GB_COLS = 64  # >= max(n_out); all BN params fit in one (8,128)-padded f32 tile


def handlandmark_kernel(x_ref, wt1_ref, wt2_ref, wt3_ref, wt4_ref, gb_ref,
                        o_ref, *, eps):
    def relu(z):
        return jnp.maximum(z, 0.0)

    def sigmoid(z):
        return 1.0 / (1.0 + jnp.exp(-z))  # EUP exp

    def layer(h, wt_ref, l, act):
        # Linear (bias omitted: it cancels exactly under train-mode BatchNorm).
        y = jnp.dot(h, wt_ref[...], preferred_element_type=jnp.float32)
        bsz, n = y.shape
        inv_b = 1.0 / bsz
        # BatchNorm1d, training mode: batch mean, biased batch variance.
        mean = jnp.sum(y, axis=0, keepdims=True) * inv_b
        centered = y - mean
        var = jnp.sum(centered * centered, axis=0, keepdims=True) * inv_b
        inv_std = jax.lax.rsqrt(var + eps)            # EUP rsqrt
        gb = gb_ref[2 * l:2 * l + 2, :n]              # (2, n): [gamma; beta]
        scale = inv_std * gb[0:1, :]                  # (1, n) reassociated affine
        z = centered * scale + gb[1:2, :]
        return act(z)

    h = x_ref[...]
    h = layer(h, wt1_ref, 0, relu)
    h = layer(h, wt2_ref, 1, relu)
    h = layer(h, wt3_ref, 2, relu)
    h = layer(h, wt4_ref, 3, sigmoid)
    o_ref[...] = h.astype(o_ref.dtype)


def prepare_params(weights, gammas, betas):
    """One-time parameter prep (outside the forward): transpose each PyTorch
    (n_out, n_inp) weight to (n_inp, n_out) and pack all gamma/beta vectors
    into one (2*L, GB_COLS) array (row 2l = gamma_l, row 2l+1 = beta_l)."""
    wts = tuple(jnp.asarray(w, jnp.float32).T for w in weights)
    gb = jnp.zeros((2 * len(weights), GB_COLS), jnp.float32)
    for l, (g, b) in enumerate(zip(gammas, betas)):
        n = g.shape[0]
        gb = gb.at[2 * l, :n].set(jnp.asarray(g, jnp.float32))
        gb = gb.at[2 * l + 1, :n].set(jnp.asarray(b, jnp.float32))
    return wts, gb


def handlandmark_forward(x, wt1, wt2, wt3, wt4, gb, *, eps=1e-5):
    """x: (B, 63) f32; wt_i pre-transposed to (n_inp, n_out); gb: packed BN params."""
    B = x.shape[0]
    n_out = wt4.shape[1]
    vmem = lambda: pl.BlockSpec(memory_space=pltpu.MemorySpace.VMEM)
    return pl.pallas_call(
        functools.partial(handlandmark_kernel, eps=eps),
        out_shape=jax.ShapeDtypeStruct((B, n_out), jnp.float32),
        in_specs=[vmem() for _ in range(6)],
        out_specs=vmem(),
    )(x, wt1, wt2, wt3, wt4, gb)


def handlandmark_ref(x, weights, biases, gammas, betas, eps=1e-5):
    """Plain-JAX reference mirroring the PyTorch forward (keeps the biases)."""
    acts = [lambda z: jnp.maximum(z, 0.0)] * 3 + [jax.nn.sigmoid]
    h = x
    for W, b, g, be, act in zip(weights, biases, gammas, betas, acts):
        y = h @ W.T + b
        mu = y.mean(0, keepdims=True)
        var = ((y - mu) ** 2).mean(0, keepdims=True)
        h = act((y - mu) / jnp.sqrt(var + eps) * g + be)
    return h


if __name__ == "__main__":
    B = 8  # small batch (>= 2 so BatchNorm training-mode stats are defined)
    key = jax.random.PRNGKey(0)
    keys = jax.random.split(key, 1 + 4 * len(LAYER_DIMS))

    x = jax.random.normal(keys[0], (B, LAYER_DIMS[0][0]), dtype=jnp.float32)

    weights, biases, gammas, betas = [], [], [], []
    for l, (n_in, n_out) in enumerate(LAYER_DIMS):
        kw, kb, kg, kbe = keys[1 + 4 * l: 1 + 4 * l + 4]
        bound = 1.0 / (n_in ** 0.5)  # nn.Linear default init range
        weights.append(jax.random.uniform(kw, (n_out, n_in), jnp.float32, -bound, bound))
        biases.append(jax.random.uniform(kb, (n_out,), jnp.float32, -bound, bound))
        # PyTorch default BN init is gamma=1, beta=0; random values here
        # exercise the packed-parameter path (same forward semantics).
        gammas.append(jax.random.uniform(kg, (n_out,), jnp.float32, 0.5, 1.5))
        betas.append(jax.random.uniform(kbe, (n_out,), jnp.float32, -0.5, 0.5))

    (wt1, wt2, wt3, wt4), gb = prepare_params(weights, gammas, betas)

    out = handlandmark_forward(x, wt1, wt2, wt3, wt4, gb)
    jax.block_until_ready(out)

    ref = handlandmark_ref(x, weights, biases, gammas, betas)
    assert out.shape == (B, LAYER_DIMS[-1][1])
    assert jnp.allclose(out, ref, atol=1e-4, rtol=1e-4), (
        float(jnp.max(jnp.abs(out - ref))))

    print("KERNEL_OK")
</pallas_src>

<mosaic_0001>
module attributes {stable_mosaic.version = 11 : i64} {
  func.func @handlandmark_kernel(%arg0: memref<8x63xf32, #tpu.memory_space<vmem>>, %arg1: memref<63x60xf32, #tpu.memory_space<vmem>>, %arg2: memref<60x40xf32, #tpu.memory_space<vmem>>, %arg3: memref<40x30xf32, #tpu.memory_space<vmem>>, %arg4: memref<30x30xf32, #tpu.memory_space<vmem>>, %arg5: memref<8x64xf32, #tpu.memory_space<vmem>>, %arg6: memref<8x30xf32, #tpu.memory_space<vmem>>) attributes {dimension_semantics = [], scalar_prefetch = 0 : i64, scratch_operands = 0 : i64, tpu.core_type = #tpu.core_type<tc>} {
    %c0 = arith.constant 0 : index
    %c0_0 = arith.constant 0 : index
    %0 = vector.load %arg0[%c0, %c0_0] : memref<8x63xf32, #tpu.memory_space<vmem>>, vector<8x63xf32>
    %c0_1 = arith.constant 0 : index
    %c0_2 = arith.constant 0 : index
    %1 = vector.load %arg1[%c0_1, %c0_2] : memref<63x60xf32, #tpu.memory_space<vmem>>, vector<63x60xf32>
    %cst = arith.constant dense<0.000000e+00> : vector<8x60xf32>
    %2 = tpu.matmul %0, %1, %cst {dimension_numbers = #tpu.dot_dimension_numbers<[1], [0], [0], [1], [0, 0, 1, 1], [], []>} : vector<8x63xf32>, vector<63x60xf32>, vector<8x60xf32> -> vector<8x60xf32>
    %cst_3 = arith.constant dense<0.000000e+00> : vector<60xf32>
    %3 = vector.multi_reduction <add>, %2, %cst_3 [0] : vector<8x60xf32> to vector<60xf32>
    %4 = vector.shape_cast %3 : vector<60xf32> to vector<1x60xf32>
    %cst_4 = arith.constant 1.250000e-01 : f32
    %5 = vector.broadcast %cst_4 : f32 to vector<1x60xf32>
    %6 = arith.mulf %4, %5 : vector<1x60xf32>
    %7 = vector.broadcast %6 : vector<1x60xf32> to vector<8x60xf32>
    %8 = arith.subf %2, %7 : vector<8x60xf32>
    %9 = arith.mulf %8, %8 : vector<8x60xf32>
    %cst_5 = arith.constant dense<0.000000e+00> : vector<60xf32>
    %10 = vector.multi_reduction <add>, %9, %cst_5 [0] : vector<8x60xf32> to vector<60xf32>
    %11 = vector.shape_cast %10 : vector<60xf32> to vector<1x60xf32>
    %cst_6 = arith.constant 1.250000e-01 : f32
    %12 = vector.broadcast %cst_6 : f32 to vector<1x60xf32>
    %13 = arith.mulf %11, %12 : vector<1x60xf32>
    %cst_7 = arith.constant 9.99999974E-6 : f32
    %14 = vector.broadcast %cst_7 : f32 to vector<1x60xf32>
    %15 = arith.addf %13, %14 : vector<1x60xf32>
    %16 = math.rsqrt %15 : vector<1x60xf32>
    %c0_8 = arith.constant 0 : index
    %c0_9 = arith.constant 0 : index
    %17 = vector.load %arg5[%c0_8, %c0_9] : memref<8x64xf32, #tpu.memory_space<vmem>>, vector<2x60xf32>
    %18 = vector.extract_strided_slice %17 {offsets = [0, 0], sizes = [1, 60], strides = [1, 1]} : vector<2x60xf32> to vector<1x60xf32>
    %19 = arith.mulf %16, %18 : vector<1x60xf32>
    %20 = vector.broadcast %19 : vector<1x60xf32> to vector<8x60xf32>
    %21 = arith.mulf %8, %20 : vector<8x60xf32>
    %22 = vector.extract_strided_slice %17 {offsets = [1, 0], sizes = [1, 60], strides = [1, 1]} : vector<2x60xf32> to vector<1x60xf32>
    %23 = vector.broadcast %22 : vector<1x60xf32> to vector<8x60xf32>
    %24 = arith.addf %21, %23 : vector<8x60xf32>
    %cst_10 = arith.constant 0.000000e+00 : f32
    %25 = vector.broadcast %cst_10 : f32 to vector<8x60xf32>
    %26 = arith.maximumf %24, %25 : vector<8x60xf32>
    %c0_11 = arith.constant 0 : index
    %c0_12 = arith.constant 0 : index
    %27 = vector.load %arg2[%c0_11, %c0_12] : memref<60x40xf32, #tpu.memory_space<vmem>>, vector<60x40xf32>
    %cst_13 = arith.constant dense<0.000000e+00> : vector<8x40xf32>
    %28 = tpu.matmul %26, %27, %cst_13 {dimension_numbers = #tpu.dot_dimension_numbers<[1], [0], [0], [1], [0, 0, 1, 1], [], []>} : vector<8x60xf32>, vector<60x40xf32>, vector<8x40xf32> -> vector<8x40xf32>
    %cst_14 = arith.constant dense<0.000000e+00> : vector<40xf32>
    %29 = vector.multi_reduction <add>, %28, %cst_14 [0] : vector<8x40xf32> to vector<40xf32>
    %30 = vector.shape_cast %29 : vector<40xf32> to vector<1x40xf32>
    %cst_15 = arith.constant 1.250000e-01 : f32
    %31 = vector.broadcast %cst_15 : f32 to vector<1x40xf32>
    %32 = arith.mulf %30, %31 : vector<1x40xf32>
    %33 = vector.broadcast %32 : vector<1x40xf32> to vector<8x40xf32>
    %34 = arith.subf %28, %33 : vector<8x40xf32>
    %35 = arith.mulf %34, %34 : vector<8x40xf32>
    %cst_16 = arith.constant dense<0.000000e+00> : vector<40xf32>
    %36 = vector.multi_reduction <add>, %35, %cst_16 [0] : vector<8x40xf32> to vector<40xf32>
    %37 = vector.shape_cast %36 : vector<40xf32> to vector<1x40xf32>
    %cst_17 = arith.constant 1.250000e-01 : f32
    %38 = vector.broadcast %cst_17 : f32 to vector<1x40xf32>
    %39 = arith.mulf %37, %38 : vector<1x40xf32>
    %cst_18 = arith.constant 9.99999974E-6 : f32
    %40 = vector.broadcast %cst_18 : f32 to vector<1x40xf32>
    %41 = arith.addf %39, %40 : vector<1x40xf32>
    %42 = math.rsqrt %41 : vector<1x40xf32>
    %c2 = arith.constant 2 : index
    %c0_19 = arith.constant 0 : index
    %43 = vector.load %arg5[%c2, %c0_19] : memref<8x64xf32, #tpu.memory_space<vmem>>, vector<2x40xf32>
    %44 = vector.extract_strided_slice %43 {offsets = [0, 0], sizes = [1, 40], strides = [1, 1]} : vector<2x40xf32> to vector<1x40xf32>
    %45 = arith.mulf %42, %44 : vector<1x40xf32>
    %46 = vector.broadcast %45 : vector<1x40xf32> to vector<8x40xf32>
    %47 = arith.mulf %34, %46 : vector<8x40xf32>
    %48 = vector.extract_strided_slice %43 {offsets = [1, 0], sizes = [1, 40], strides = [1, 1]} : vector<2x40xf32> to vector<1x40xf32>
    %49 = vector.broadcast %48 : vector<1x40xf32> to vector<8x40xf32>
    %50 = arith.addf %47, %49 : vector<8x40xf32>
    %cst_20 = arith.constant 0.000000e+00 : f32
    %51 = vector.broadcast %cst_20 : f32 to vector<8x40xf32>
    %52 = arith.maximumf %50, %51 : vector<8x40xf32>
    %c0_21 = arith.constant 0 : index
    %c0_22 = arith.constant 0 : index
    %53 = vector.load %arg3[%c0_21, %c0_22] : memref<40x30xf32, #tpu.memory_space<vmem>>, vector<40x30xf32>
    %cst_23 = arith.constant dense<0.000000e+00> : vector<8x30xf32>
    %54 = tpu.matmul %52, %53, %cst_23 {dimension_numbers = #tpu.dot_dimension_numbers<[1], [0], [0], [1], [0, 0, 1, 1], [], []>} : vector<8x40xf32>, vector<40x30xf32>, vector<8x30xf32> -> vector<8x30xf32>
    %cst_24 = arith.constant dense<0.000000e+00> : vector<30xf32>
    %55 = vector.multi_reduction <add>, %54, %cst_24 [0] : vector<8x30xf32> to vector<30xf32>
    %56 = vector.shape_cast %55 : vector<30xf32> to vector<1x30xf32>
    %cst_25 = arith.constant 1.250000e-01 : f32
    %57 = vector.broadcast %cst_25 : f32 to vector<1x30xf32>
    %58 = arith.mulf %56, %57 : vector<1x30xf32>
    %59 = vector.broadcast %58 : vector<1x30xf32> to vector<8x30xf32>
    %60 = arith.subf %54, %59 : vector<8x30xf32>
    %61 = arith.mulf %60, %60 : vector<8x30xf32>
    %cst_26 = arith.constant dense<0.000000e+00> : vector<30xf32>
    %62 = vector.multi_reduction <add>, %61, %cst_26 [0] : vector<8x30xf32> to vector<30xf32>
    %63 = vector.shape_cast %62 : vector<30xf32> to vector<1x30xf32>
    %cst_27 = arith.constant 1.250000e-01 : f32
    %64 = vector.broadcast %cst_27 : f32 to vector<1x30xf32>
    %65 = arith.mulf %63, %64 : vector<1x30xf32>
    %cst_28 = arith.constant 9.99999974E-6 : f32
    %66 = vector.broadcast %cst_28 : f32 to vector<1x30xf32>
    %67 = arith.addf %65, %66 : vector<1x30xf32>
    %68 = math.rsqrt %67 : vector<1x30xf32>
    %c4 = arith.constant 4 : index
    %c0_29 = arith.constant 0 : index
    %69 = vector.load %arg5[%c4, %c0_29] : memref<8x64xf32, #tpu.memory_space<vmem>>, vector<2x30xf32>
    %70 = vector.extract_strided_slice %69 {offsets = [0, 0], sizes = [1, 30], strides = [1, 1]} : vector<2x30xf32> to vector<1x30xf32>
    %71 = arith.mulf %68, %70 : vector<1x30xf32>
    %72 = vector.broadcast %71 : vector<1x30xf32> to vector<8x30xf32>
    %73 = arith.mulf %60, %72 : vector<8x30xf32>
    %74 = vector.extract_strided_slice %69 {offsets = [1, 0], sizes = [1, 30], strides = [1, 1]} : vector<2x30xf32> to vector<1x30xf32>
    %75 = vector.broadcast %74 : vector<1x30xf32> to vector<8x30xf32>
    %76 = arith.addf %73, %75 : vector<8x30xf32>
    %cst_30 = arith.constant 0.000000e+00 : f32
    %77 = vector.broadcast %cst_30 : f32 to vector<8x30xf32>
    %78 = arith.maximumf %76, %77 : vector<8x30xf32>
    %c0_31 = arith.constant 0 : index
    %c0_32 = arith.constant 0 : index
    %79 = vector.load %arg4[%c0_31, %c0_32] : memref<30x30xf32, #tpu.memory_space<vmem>>, vector<30x30xf32>
    %cst_33 = arith.constant dense<0.000000e+00> : vector<8x30xf32>
    %80 = tpu.matmul %78, %79, %cst_33 {dimension_numbers = #tpu.dot_dimension_numbers<[1], [0], [0], [1], [0, 0, 1, 1], [], []>} : vector<8x30xf32>, vector<30x30xf32>, vector<8x30xf32> -> vector<8x30xf32>
    %cst_34 = arith.constant dense<0.000000e+00> : vector<30xf32>
    %81 = vector.multi_reduction <add>, %80, %cst_34 [0] : vector<8x30xf32> to vector<30xf32>
    %82 = vector.shape_cast %81 : vector<30xf32> to vector<1x30xf32>
    %cst_35 = arith.constant 1.250000e-01 : f32
    %83 = vector.broadcast %cst_35 : f32 to vector<1x30xf32>
    %84 = arith.mulf %82, %83 : vector<1x30xf32>
    %85 = vector.broadcast %84 : vector<1x30xf32> to vector<8x30xf32>
    %86 = arith.subf %80, %85 : vector<8x30xf32>
    %87 = arith.mulf %86, %86 : vector<8x30xf32>
    %cst_36 = arith.constant dense<0.000000e+00> : vector<30xf32>
    %88 = vector.multi_reduction <add>, %87, %cst_36 [0] : vector<8x30xf32> to vector<30xf32>
    %89 = vector.shape_cast %88 : vector<30xf32> to vector<1x30xf32>
    %cst_37 = arith.constant 1.250000e-01 : f32
    %90 = vector.broadcast %cst_37 : f32 to vector<1x30xf32>
    %91 = arith.mulf %89, %90 : vector<1x30xf32>
    %cst_38 = arith.constant 9.99999974E-6 : f32
    %92 = vector.broadcast %cst_38 : f32 to vector<1x30xf32>
    %93 = arith.addf %91, %92 : vector<1x30xf32>
    %94 = math.rsqrt %93 : vector<1x30xf32>
    %c6 = arith.constant 6 : index
    %c0_39 = arith.constant 0 : index
    %95 = vector.load %arg5[%c6, %c0_39] : memref<8x64xf32, #tpu.memory_space<vmem>>, vector<2x30xf32>
    %96 = vector.extract_strided_slice %95 {offsets = [0, 0], sizes = [1, 30], strides = [1, 1]} : vector<2x30xf32> to vector<1x30xf32>
    %97 = arith.mulf %94, %96 : vector<1x30xf32>
    %98 = vector.broadcast %97 : vector<1x30xf32> to vector<8x30xf32>
    %99 = arith.mulf %86, %98 : vector<8x30xf32>
    %100 = vector.extract_strided_slice %95 {offsets = [1, 0], sizes = [1, 30], strides = [1, 1]} : vector<2x30xf32> to vector<1x30xf32>
    %101 = vector.broadcast %100 : vector<1x30xf32> to vector<8x30xf32>
    %102 = arith.addf %99, %101 : vector<8x30xf32>
    %cst_40 = arith.constant 0.000000e+00 : f32
    %103 = vector.broadcast %cst_40 : f32 to vector<8x30xf32>
    %104 = arith.subf %103, %102 : vector<8x30xf32>
    %105 = math.exp %104 : vector<8x30xf32>
    %cst_41 = arith.constant 1.000000e+00 : f32
    %106 = vector.broadcast %cst_41 : f32 to vector<8x30xf32>
    %107 = arith.addf %106, %105 : vector<8x30xf32>
    %cst_42 = arith.constant 1.000000e+00 : f32
    %108 = vector.broadcast %cst_42 : f32 to vector<8x30xf32>
    %109 = arith.divf %108, %107 : vector<8x30xf32>
    %c0_43 = arith.constant 0 : index
    %c0_44 = arith.constant 0 : index
    %110 = vector.load %arg6[%c0_43, %c0_44] : memref<8x30xf32, #tpu.memory_space<vmem>>, vector<8x30xf32>
    tpu.vector_store %arg6[%c0_43, %c0_44], %109 {strides = array<i32>} : memref<8x30xf32, #tpu.memory_space<vmem>>, vector<8x30xf32>,
    return
  }
}

</mosaic_0001>

<bundles_post_ra>
// kernel: tpu_custom_call.1
= control target key start
LH: loop header
LB: loop body
LE: loop exit
PB: predicated region body
PF: predicated region fallthrough
CT: control target
= control target key end

     0   :  { %vm37_vm0 = vcmask 1046528   ;;  %s524_s0 = inlined_call_operand.vmem [shape: f32[8,63], index: 0, kind: input, shape index: {}]   ;;  %s525_s1 = inlined_call_operand.vmem [shape: f32[63,60], index: 1, kind: input, shape index: {}]   ;;  %s526_s2 = inlined_call_operand.vmem [shape: f32[60,40], index: 2, kind: input, shape index: {}]   ;;  %s527_s3 = inlined_call_operand.vmem [shape: f32[40,30], index: 3, kind: input, shape index: {}]   ;;  %s528_s4 = inlined_call_operand.vmem [shape: f32[30,30], index: 4, kind: input, shape index: {}]   ;;  %s529_s5 = inlined_call_operand.vmem [shape: f32[8,64], index: 5, kind: input, shape index: {}]   ;;  %s530_s6 = inlined_call_operand.hbm [shape: f32[8,30], index: 6, kind: output, shape index: {}]  }
   0x1   :  { %v32_v0 = vld [vmem:[%s525_s1 + $0x38] sm:$0x7f]  ;;  %v31_v1 = vld [vmem:[%s525_s1 + $0x30] sm:$0xff]  ;;  %v30_v2 = vld [vmem:[%s525_s1 + $0x28] sm:$0xff] }
   0x2   :  { %337 = vmatpush.msk.msra.mxu0 %vm37_vm0, %v32_v0 }
   0x4   :  { %50 = vmatpush.msra.mxu0 %v31_v1 }
   0x5   :  { %11 = vsyncpa [#allocation3], 0  ;;  %v29_v3 = vld [vmem:[%s525_s1 + $0x20] sm:$0xff]  ;;  %v28_v4 = vld [vmem:[%s525_s1 + $0x18] sm:$0xff]  ;;  %vm33_vm1 = vcmask 515072   ;;  %vm61_vm2 = vcmask 490496  }
   0x6   :  { %51 = vmatpush.msra.mxu0 %v30_v2  ;;  %v27_v5 = vld [vmem:[%s525_s1 + $0x10] sm:$0xff]  ;;  %v26_v6 = vld [vmem:[%s525_s1 + $0x8] sm:$0xff]  ;;  %v25_v7 = vld [vmem:[%s525_s1] sm:$0xff]  ;;  %vm109_vm3 = vcmask 1043456   ;;  %vm133_vm7 = vcmask 326656   ;;  %vm198_vm11 = vcmask 244736  }
   0x7   :  { %v24_v8 = vld [vmem:[%s524_s0] sm:$0xff]  ;;  %v105_v19 = vld [vmem:[%s526_s2 + $0x38] sm:$0xf]  ;;  %v104_v21 = vld [vmem:[%s526_s2 + $0x30] sm:$0xff]  ;;  %vm242_vm12 = vcmask 1045504   ;;  %s328_s29 = sshll.u32 %s530_s6, 4  ;;  %s329_s29 = int_to_ptr.hbm [resolvable:$true] %s328_s29 }
   0x8   :  { %52 = vmatpush.msra.mxu0 %v29_v3  ;;  %339 = vmatpush.msk.msra.mxu1 %vm109_vm3, %v105_v19  ;;  %v103_v24 = vld [vmem:[%s526_s2 + $0x28] sm:$0xff]  ;;  %v102_v26 = vld [vmem:[%s526_s2 + $0x20] sm:$0xff]  ;;  %v101_v28 = vld [vmem:[%s526_s2 + $0x18] sm:$0xff] }
   0x9   :  { %v100_v30 = vld [vmem:[%s526_s2 + $0x10] sm:$0xff]  ;;  %v99_v31 = vld [vmem:[%s526_s2 + $0x8] sm:$0xff]  ;;  %v98_v33 = vld [vmem:[%s526_s2] sm:$0xff] }
   0xa   :  { %53 = vmatpush.msra.mxu0 %v28_v4  ;;  %122 = vmatpush.msra.mxu1 %v104_v21  ;;  %v91_v43 = vld [vmem:[%s529_s5] sm:$0x3]  ;;  %v173_v3 = vld [vmem:[%s527_s3 + $0x18] sm:$0xff] }
   0xb   :  { %v95_v47 = vperm.slane %v91_v43, 1  ;;  %v174_v1 = vld [vmem:[%s527_s3 + $0x20] sm:$0xff] }
   0xc   :  { %54 = vmatpush.msra.mxu0 %v27_v5  ;;  %123 = vmatpush.msra.mxu1 %v103_v24  ;;  %v172_v5 = vld [vmem:[%s527_s3 + $0x10] sm:$0xff] }
   0xd   :  { %189 = vmatpush.msra.mxu2 %v174_v1 }
   0xe   :  { %55 = vmatpush.msra.mxu0 %v26_v6  ;;  %124 = vmatpush.msra.mxu1 %v102_v26  ;;  %v171_v6 = vld [vmem:[%s527_s3 + $0x8] sm:$0xff] }
   0xf   :  { %190 = vmatpush.msra.mxu2 %v173_v3 }
  0x10   :  { %56 = vmatpush.msra.mxu0 %v25_v7  ;;  %125 = vmatpush.msra.mxu1 %v101_v28 }
  0x11   :  { %338 = vmatmul.msk.f32.vlgmr.msra.gmra.mxu0 %vm33_vm1, %v24_v8  ;;  %191 = vmatpush.msra.mxu2 %v172_v5  ;;  %v170_v8 = vld [vmem:[%s527_s3] sm:$0xff] }
  0x12   :  { %126 = vmatpush.msra.mxu1 %v100_v30 }
  0x13   :  { %192 = vmatpush.msra.mxu2 %v171_v6 }
  0x14   :  { %127 = vmatpush.msra.mxu1 %v99_v31 }
  0x15   :  { %193 = vmatpush.msra.mxu2 %v170_v8 }
  0x16   :  { %128 = vmatpush.msra.mxu1 %v98_v33 }
  0x8e   :  { %v58_v9 = vpop.f32.mrf.mxu0 }
  0x8f   :  { %v62_v10 = vsel %vm61_vm2, %v58_v9, 0.0 }
  0x90   :  { %v63_v11 = vrot.slane %v62_v10, 4 }
  0x92   :  { %v64_v12 = vadd.f32 %v63_v11, %v62_v10 }
  0x94   :  { %v65_v13 = vrot.slane %v64_v12, 2 }
  0x96   :  { %v66_v14 = vadd.f32 %v65_v13, %v64_v12 }
  0x98   :  { %v67_v15 = vrot.slane %v66_v14, 1 }
  0x9a   :  { %v68_v16 = vadd.f32 %v67_v15, %v66_v14 }
  0x9c   :  { %v69_v17 = vmul.f32 0.125, %v68_v16 }
  0x9e   :  { %v70_v18 = vsub.f32 %v58_v9, %v69_v17 }
  0xa0   :  { %v71_v20 = vmul.f32 %v70_v18, %v70_v18 }
  0xa2   :  { %v72_v22 = vsel %vm61_vm2, %v71_v20, 0.0 }
  0xa3   :  { %v73_v23 = vrot.slane %v72_v22, 4 }
  0xa5   :  { %v74_v25 = vadd.f32 %v73_v23, %v72_v22 }
  0xa7   :  { %v75_v27 = vrot.slane %v74_v25, 2 }
  0xa9   :  { %v76_v29 = vadd.f32 %v75_v27, %v74_v25 }
  0xab   :  { %v77_v32 = vrot.slane %v76_v29, 1 }
  0xad   :  { %v78_v34 = vadd.f32 %v77_v32, %v76_v29 }
  0xaf   :  { %v79_v35 = vmul.f32 0.125, %v78_v34 }
  0xb1   :  { %v80_v36 = vadd.f32 1e-05, %v79_v35 }
  0xb3   :  { %345 = vrsqrt.f32 %v80_v36  ;;  %vm87_vm5 = vweird.f32 %v80_v36 }
  0xb9   :  { %v346_v37 = vpop.eup %345 }
  0xba   :  { %v82_v38 = vmul.f32 %v346_v37, %v80_v36  ;;  %vm88_vm4 = vweird.f32 %v346_v37 }
  0xbb   :  { %vm89_vm6 = vmor %vm87_vm5, %vm88_vm4 }
  0xbc   :  { %v83_v39 = vmul.f32 %v346_v37, %v82_v38 }
  0xbe   :  { %v84_v40 = vmul.f32 0.5, %v83_v39 }
  0xc0   :  { %v85_v41 = vsub.f32 1.5, %v84_v40 }
  0xc2   :  { %v86_v42 = vmul.f32 %v346_v37, %v85_v41  ;;  %v238_v41 = vld [vmem:[%s528_s4 + $0x18] sm:$0x3f] }
  0xc3   :  { %342 = vmatpush.msk.msra.mxu3 %vm242_vm12, %v238_v41 }
  0xc4   :  { %v90_v44 = vsel %vm89_vm6, %v346_v37, %v86_v42 }
  0xc5   :  { %v92_v45 = vmul.f32 %v91_v43, %v90_v44  ;;  %v237_v43 = vld [vmem:[%s528_s4 + $0x10] sm:$0xff]  ;;  %v236_v44 = vld [vmem:[%s528_s4 + $0x8] sm:$0xff] }
  0xc6   :  { %259 = vmatpush.msra.mxu3 %v237_v43 }
  0xc7   :  { %v93_v46 = vperm.slane %v92_v45, 0 }
  0xc8   :  { %260 = vmatpush.msra.mxu3 %v236_v44 }
  0xc9   :  { %v94_v48 = vmul.f32 %v93_v46, %v70_v18  ;;  %v163_v18 = vld [vmem:[%s529_s5 + $0x2] sm:$0x3] }
  0xca   :  { %v167_v22 = vperm.slane %v163_v18, 1  ;;  %v235_v46 = vld [vmem:[%s528_s4] sm:$0xff] }
  0xcb   :  { %v96_v49 = vadd.f32 %v95_v47, %v94_v48  ;;  %261 = vmatpush.msra.mxu3 %v235_v46 }
  0xcd   :  { %v97_v50 = vmax.f32 %v96_v49, 0.0 }
  0xcf   :  { %340 = vmatmul.msk.f32.vlgmr.msra.gmra.mxu1 %vm61_vm2, %v97_v50 }
 0x14c   :  { %v130_v51 = vpop.f32.mrf.mxu1 }
 0x14d   :  { %v134_v52 = vsel %vm133_vm7, %v130_v51, 0.0 }
 0x14e   :  { %v135_v53 = vrot.slane %v134_v52, 4 }
 0x150   :  { %v136_v54 = vadd.f32 %v135_v53, %v134_v52 }
 0x152   :  { %v137_v55 = vrot.slane %v136_v54, 2 }
 0x154   :  { %v138_v56 = vadd.f32 %v137_v55, %v136_v54 }
 0x156   :  { %v139_v57 = vrot.slane %v138_v56, 1 }
 0x158   :  { %v140_v58 = vadd.f32 %v139_v57, %v138_v56  ;;  %v228_v56 = vld [vmem:[%s529_s5 + $0x4] sm:$0x3] }
 0x15a   :  { %v141_v59 = vmul.f32 0.125, %v140_v58 }
 0x15c   :  { %v142_v60 = vsub.f32 %v130_v51, %v141_v59 }
 0x15e   :  { %v143_v61 = vmul.f32 %v142_v60, %v142_v60 }
 0x160   :  { %v144_v62 = vsel %vm133_vm7, %v143_v61, 0.0 }
 0x161   :  { %v145_v63 = vrot.slane %v144_v62, 4 }
 0x163   :  { %v146_v0 = vadd.f32 %v145_v63, %v144_v62 }
 0x165   :  { %v147_v2 = vrot.slane %v146_v0, 2 }
 0x167   :  { %v148_v4 = vadd.f32 %v147_v2, %v146_v0 }
 0x169   :  { %v149_v7 = vrot.slane %v148_v4, 1 }
 0x16b   :  { %v150_v9 = vadd.f32 %v149_v7, %v148_v4 }
 0x16d   :  { %v151_v10 = vmul.f32 0.125, %v150_v9 }
 0x16f   :  { %v152_v11 = vadd.f32 1e-05, %v151_v10 }
 0x171   :  { %347 = vrsqrt.f32 %v152_v11  ;;  %vm159_vm9 = vweird.f32 %v152_v11 }
 0x177   :  { %v348_v12 = vpop.eup %347 }
 0x178   :  { %v154_v13 = vmul.f32 %v348_v12, %v152_v11  ;;  %vm160_vm8 = vweird.f32 %v348_v12 }
 0x179   :  { %vm161_vm10 = vmor %vm159_vm9, %vm160_vm8 }
 0x17a   :  { %v155_v14 = vmul.f32 %v348_v12, %v154_v13 }
 0x17c   :  { %v156_v15 = vmul.f32 0.5, %v155_v14 }
 0x17e   :  { %v157_v16 = vsub.f32 1.5, %v156_v15 }
 0x180   :  { %v158_v17 = vmul.f32 %v348_v12, %v157_v16 }
 0x182   :  { %v162_v19 = vsel %vm161_vm10, %v348_v12, %v158_v17 }
 0x183   :  { %v164_v20 = vmul.f32 %v163_v18, %v162_v19 }
 0x185   :  { %v165_v21 = vperm.slane %v164_v20, 0 }
 0x187   :  { %v166_v23 = vmul.f32 %v165_v21, %v142_v60  ;;  %v232_v60 = vperm.slane %v228_v56, 1 }
 0x189   :  { %v168_v24 = vadd.f32 %v167_v22, %v166_v23 }
 0x18b   :  { %v169_v25 = vmax.f32 %v168_v24, 0.0 }
 0x18d   :  { %341 = vmatmul.msk.f32.vlgmr.msra.gmra.mxu2 %vm133_vm7, %v169_v25 }
 0x210   :  { %v195_v26 = vpop.f32.mrf.mxu2 }
 0x211   :  { %v199_v27 = vsel %vm198_vm11, %v195_v26, 0.0 }
 0x212   :  { %v200_v28 = vrot.slane %v199_v27, 4 }
 0x214   :  { %v201_v29 = vadd.f32 %v200_v28, %v199_v27 }
 0x216   :  { %v202_v30 = vrot.slane %v201_v29, 2 }
 0x218   :  { %v203_v31 = vadd.f32 %v202_v30, %v201_v29 }
 0x21a   :  { %v204_v32 = vrot.slane %v203_v31, 1 }
 0x21c   :  { %v205_v33 = vadd.f32 %v204_v32, %v203_v31 }
 0x21e   :  { %v206_v34 = vmul.f32 0.125, %v205_v33 }
 0x220   :  { %v207_v35 = vsub.f32 %v195_v26, %v206_v34  ;;  %v295_v26 = vld [vmem:[%s529_s5 + $0x6] sm:$0x3]  ;;  %s383_s5 = smov [#allocation2]  }
 0x221   :  { %v299_v30 = vperm.slane %v295_v26, 1  ;;  %s326_s26 = sshll.u32 %s383_s5, 4  ;;  %s327_s26 = int_to_ptr.vmem [resolvable:$true] %s326_s26 }
 0x222   :  { %v208_v36 = vmul.f32 %v207_v35, %v207_v35 }
 0x224   :  { %v209_v37 = vsel %vm198_vm11, %v208_v36, 0.0 }
 0x225   :  { %v210_v38 = vrot.slane %v209_v37, 4 }
 0x227   :  { %v211_v39 = vadd.f32 %v210_v38, %v209_v37 }
 0x229   :  { %v212_v40 = vrot.slane %v211_v39, 2 }
 0x22b   :  { %v213_v42 = vadd.f32 %v212_v40, %v211_v39 }
 0x22d   :  { %v214_v45 = vrot.slane %v213_v42, 1 }
 0x22f   :  { %v215_v47 = vadd.f32 %v214_v45, %v213_v42 }
 0x231   :  { %v216_v48 = vmul.f32 0.125, %v215_v47 }
 0x233   :  { %v217_v49 = vadd.f32 1e-05, %v216_v48 }
 0x235   :  { %349 = vrsqrt.f32 %v217_v49  ;;  %vm224_vm14 = vweird.f32 %v217_v49 }
 0x23b   :  { %v350_v50 = vpop.eup %349 }
 0x23c   :  { %v219_v51 = vmul.f32 %v350_v50, %v217_v49  ;;  %vm225_vm13 = vweird.f32 %v350_v50 }
 0x23d   :  { %vm226_vm15 = vmor %vm224_vm14, %vm225_vm13 }
 0x23e   :  { %v220_v52 = vmul.f32 %v350_v50, %v219_v51 }
 0x240   :  { %v221_v53 = vmul.f32 0.5, %v220_v52 }
 0x242   :  { %v222_v54 = vsub.f32 1.5, %v221_v53 }
 0x244   :  { %v223_v55 = vmul.f32 %v350_v50, %v222_v54 }
 0x246   :  { %v227_v57 = vsel %vm226_vm15, %v350_v50, %v223_v55 }
 0x247   :  { %v229_v58 = vmul.f32 %v228_v56, %v227_v57 }
 0x249   :  { %v230_v59 = vperm.slane %v229_v58, 0 }
 0x24b   :  { %v231_v61 = vmul.f32 %v230_v59, %v207_v35 }
 0x24d   :  { %v233_v62 = vadd.f32 %v232_v60, %v231_v61 }
 0x24f   :  { %v234_v63 = vmax.f32 %v233_v62, 0.0 }
 0x251   :  { %343 = vmatmul.msk.f32.vlgmr.msra.gmra.mxu3 %vm198_vm11, %v234_v63 }
 0x2d4   :  { %v263_v0 = vpop.f32.mrf.mxu3 }
 0x2d5   :  { %v266_v1 = vsel %vm198_vm11, %v263_v0, 0.0 }
 0x2d6   :  { %v267_v2 = vrot.slane %v266_v1, 4 }
 0x2d8   :  { %v268_v3 = vadd.f32 %v267_v2, %v266_v1 }
 0x2da   :  { %v269_v4 = vrot.slane %v268_v3, 2 }
 0x2dc   :  { %v270_v5 = vadd.f32 %v269_v4, %v268_v3 }
 0x2de   :  { %v271_v6 = vrot.slane %v270_v5, 1 }
 0x2e0   :  { %v272_v7 = vadd.f32 %v271_v6, %v270_v5 }
 0x2e2   :  { %v273_v8 = vmul.f32 0.125, %v272_v7 }
 0x2e4   :  { %v274_v9 = vsub.f32 %v263_v0, %v273_v8 }
 0x2e6   :  { %v275_v10 = vmul.f32 %v274_v9, %v274_v9 }
 0x2e8   :  { %v276_v11 = vsel %vm198_vm11, %v275_v10, 0.0 }
 0x2e9   :  { %v277_v12 = vrot.slane %v276_v11, 4 }
 0x2eb   :  { %v278_v13 = vadd.f32 %v277_v12, %v276_v11 }
 0x2ed   :  { %v279_v14 = vrot.slane %v278_v13, 2 }
 0x2ef   :  { %v280_v15 = vadd.f32 %v279_v14, %v278_v13 }
 0x2f1   :  { %v281_v16 = vrot.slane %v280_v15, 1 }
 0x2f3   :  { %v282_v17 = vadd.f32 %v281_v16, %v280_v15 }
 0x2f5   :  { %v283_v18 = vmul.f32 0.125, %v282_v17 }
 0x2f7   :  { %v284_v19 = vadd.f32 1e-05, %v283_v18 }
 0x2f9   :  { %351 = vrsqrt.f32 %v284_v19  ;;  %vm291_vm1 = vweird.f32 %v284_v19 }
 0x2ff   :  { %v352_v20 = vpop.eup %351 }
 0x300   :  { %v286_v21 = vmul.f32 %v352_v20, %v284_v19  ;;  %vm292_vm0 = vweird.f32 %v352_v20 }
 0x301   :  { %vm293_vm2 = vmor %vm291_vm1, %vm292_vm0 }
 0x302   :  { %v287_v22 = vmul.f32 %v352_v20, %v286_v21 }
 0x304   :  { %v288_v23 = vmul.f32 0.5, %v287_v22 }
 0x306   :  { %v289_v24 = vsub.f32 1.5, %v288_v23 }
 0x308   :  { %v290_v25 = vmul.f32 %v352_v20, %v289_v24 }
 0x30a   :  { %v294_v27 = vsel %vm293_vm2, %v352_v20, %v290_v25 }
 0x30b   :  { %v296_v28 = vmul.f32 %v295_v26, %v294_v27 }
 0x30d   :  { %v297_v29 = vperm.slane %v296_v28, 0 }
 0x30f   :  { %v298_v31 = vmul.f32 %v297_v29, %v274_v9 }
 0x311   :  { %v300_v32 = vadd.f32 %v299_v30, %v298_v31 }
 0x313   :  { %v301_v33 = vsub.f32 0.0, %v300_v32 }
 0x315   :  { %v302_v34 = vmul.f32 1.442695, %v301_v33 }
 0x317   :  { %353 = vpow2.f32 %v302_v34 }
 0x31d   :  { %v354_v35 = vpop.eup %353 }
 0x31e   :  { %v304_v36 = vadd.f32 1.0, %v354_v35 }
 0x320   :  { %355 = vrcp.f32 %v304_v36  ;;  %v316_v40 = vand.u32 2147483648, %v304_v36  ;;  %v314_v42 = vand.u32 2147483647, %v304_v36  ;;  %vm310_vm4 = vweird.f32 %v304_v36 }
 0x322   :  { %v317_v44 = vor.u32 1.1754944e-38, %v316_v40  ;;  %vm315_vm6 = vcmp.eq.f32.partialorder %v314_v42, 8.507059e+37 }
 0x326   :  { %v356_v37 = vpop.eup %355 }
 0x327   :  { %v306_v38 = vmul.f32 %v356_v37, %v304_v36  ;;  %vm311_vm3 = vweird.f32 %v356_v37 }
 0x328   :  { %vm312_vm5 = vmor %vm310_vm4, %vm311_vm3 }
 0x329   :  { %v307_v39 = vsub.f32 1.0, %v306_v38 }
 0x32b   :  { %v308_v41 = vmul.f32 %v356_v37, %v307_v39 }
 0x32d   :  { %v309_v43 = vadd.f32 %v356_v37, %v308_v41 }
 0x32f   :  { %v313_v45 = vsel %vm312_vm5, %v356_v37, %v309_v43 }
 0x330   :  { %v318_v46 = vsel %vm315_vm6, %v317_v44, %v313_v45 }
 0x331   :  { %320 = vst.msk [vmem:[#allocation2] sm:$0xff] %vm198_vm11, %v318_v46 }
 0x332   :  { %331 = dma.vmem_to_hbm [thread:$0]  %s327_s26, 128, %s329_s29, [#allocation3]  }
 0x333   :  { %381 = dma.done.wait [#allocation3], 128  }
 0x334   :  { %382 = vsyncadd [#allocation3], 4294967168 }
 0x335   :  { %336 = vsyncpa [#allocation3], 1 }

</bundles_post_ra>
